<compile_context>
chip_gen: v5e
topology: v5e:2x2
jax: 0.10.0
libtpu: 0.0.40
codegen_flags: <defaults>
</compile_context>

<pallas_src>
import functools

import jax
import jax.numpy as jnp
from jax.experimental import pallas as pl
from jax.experimental.pallas import tpu as pltpu


def _round_up(n, m):
    return ((n + m - 1) // m) * m


def _pad2(a, rows, cols):
    r, c = a.shape
    if r == rows and c == cols:
        return a
    return jnp.pad(a, ((0, rows - r), (0, cols - c)))


def _vmem_footprint(tile_rows, in_dim, mid_pad, out_pad):
    """Approximate per-step VMEM bytes for the pipeline."""
    f32, bf16 = 4, 2
    x_bytes = 2 * tile_rows * in_dim * f32                       # x tiles, double-buffered
    w_bytes = (in_dim * mid_pad + mid_pad * mid_pad
               + mid_pad * out_pad) * bf16                       # weights, single-buffered
    b_bytes = (2 * mid_pad + out_pad) * f32                      # biases
    o_bytes = 2 * tile_rows * out_pad * f32                      # out tiles, double-buffered
    act_bytes = (tile_rows * mid_pad * (f32 + bf16) * 2          # h1/h2 f32 + bf16 casts
                 + tile_rows * out_pad * f32)                    # pre-store out
    return x_bytes + w_bytes + b_bytes + o_bytes + act_bytes


def _seq_inception_kernel(x_ref, w1_ref, b1_ref, w2_ref, b2_ref,
                          w3_ref, b3_ref, o_ref, *, normalized, compute_dtype):
    # x_ref:  (tile_rows, in_dim)  float32  -> cast to bf16 per tile (VPU, hides under MXU)
    # wN_ref: (fan_in, fan_out)    bf16
    # bN_ref: (1, fan_out)         float32
    x = x_ref[...].astype(compute_dtype)

    h1 = jnp.dot(x, w1_ref[...], preferred_element_type=jnp.float32)
    h1 = jnp.maximum(h1 + b1_ref[...], 0.0)                      # bias + ReLU (f32)

    h2 = jnp.dot(h1.astype(compute_dtype), w2_ref[...],
                 preferred_element_type=jnp.float32)
    h2 = jnp.maximum(h2 + b2_ref[...], 0.0)                      # bias + ReLU (f32)

    out = jnp.dot(h2.astype(compute_dtype), w3_ref[...],
                  preferred_element_type=jnp.float32)
    out = out + b3_ref[...]

    if normalized:
        # out / ||out||_2 == out * rsqrt(sum(out^2)); rsqrt runs on the EUP.
        # 0-norm rows -> 0*inf -> nan -> 0; overflow rows -> nan/inf -> 0
        # (matches the torch isnan/isinf fixups).  Padded columns are exactly
        # zero so they do not change sum(out^2).
        sumsq = jnp.sum(out * out, axis=-1, keepdims=True)
        out = out * jax.lax.rsqrt(sumsq)
        out = jnp.where(jnp.isfinite(out), out, 0.0)

    o_ref[...] = out.astype(o_ref.dtype)


def sequence_inception(x, params, *, normalized=1, tile_rows=1024,
                       compute_dtype=jnp.bfloat16):
    """x: (B, T, in_dim) float32.  params: dict of w1,b1,w2,b2,w3,b3 (f32)."""
    B, T, in_dim = x.shape
    w1, b1 = params["w1"], params["b1"]          # (in_dim, mid), (1, mid)
    w2, b2 = params["w2"], params["b2"]          # (mid, mid),    (1, mid)
    w3, b3 = params["w3"], params["b3"]          # (mid, out),    (1, out)
    mid_dim = w1.shape[1]
    out_dim = w3.shape[1]

    # Lane-dense padded widths (multiples of 128; 256 would fully fill the
    # v6e/v7x MXU N dim, but 128 already makes the output store unmasked).
    mid_pad = _round_up(mid_dim, 128)
    out_pad = _round_up(out_dim, 128)

    n_rows = B * T

    # --- row tile selection -------------------------------------------------
    # Shrink for tiny inputs (keep a multiple of 8 sublanes).
    tile_rows = max(8, min(tile_rows, _round_up(n_rows, 8)))
    # v7x megacore: make sure the "parallel" row axis has >=2 steps whenever
    # there is more than one sublane-group of rows, so both TCs get work.
    if n_rows > 8 and pl.cdiv(n_rows, tile_rows) < 2:
        tile_rows = max(8, _round_up((n_rows + 1) // 2, 8))
    # Keep the per-step VMEM footprint under a budget that fits v7x (64 MiB).
    VMEM_BUDGET = 44 * 2**20
    while tile_rows > 8 and _vmem_footprint(tile_rows, in_dim, mid_pad, out_pad) > VMEM_BUDGET:
        tile_rows = max(8, _round_up(tile_rows // 2, 8))

    footprint = _vmem_footprint(tile_rows, in_dim, mid_pad, out_pad)
    vmem_limit = int(min(64 * 2**20, max(32 * 2**20, footprint + 8 * 2**20)))

    grid = (pl.cdiv(n_rows, tile_rows),)         # ragged last block handled by Pallas

    # --- operand prep (weights only; x stays f32 and untouched in HBM) ------
    x2d = x.reshape(n_rows, in_dim)              # leading-dim reshape: no HBM pass
    w1c = _pad2(w1, in_dim, mid_pad).astype(compute_dtype)
    w2c = _pad2(w2, mid_pad, mid_pad).astype(compute_dtype)
    w3c = _pad2(w3, mid_pad, out_pad).astype(compute_dtype)
    b1f = _pad2(b1, 1, mid_pad).astype(jnp.float32)
    b2f = _pad2(b2, 1, mid_pad).astype(jnp.float32)
    b3f = _pad2(b3, 1, out_pad).astype(jnp.float32)

    kernel = functools.partial(_seq_inception_kernel,
                               normalized=(normalized == 1),
                               compute_dtype=compute_dtype)

    # Constant-index weights/biases: single-buffer them (they're DMA'd once;
    # double-buffering only burns VMEM headroom, which matters on v7x).
    resident = lambda shape: pl.BlockSpec(shape, lambda i: (0, 0),
                                          pipeline_mode=pl.Buffered(1))

    out2d = pl.pallas_call(
        kernel,
        out_shape=jax.ShapeDtypeStruct((n_rows, out_pad), x.dtype),
        grid_spec=pl.GridSpec(
            grid=grid,
            in_specs=[
                pl.BlockSpec((tile_rows, in_dim), lambda i: (i, 0)),   # x rows
                resident((in_dim, mid_pad)),                           # w1
                resident((1, mid_pad)),                                # b1
                resident((mid_pad, mid_pad)),                          # w2
                resident((1, mid_pad)),                                # b2
                resident((mid_pad, out_pad)),                          # w3
                resident((1, out_pad)),                                # b3
            ],
            out_specs=pl.BlockSpec((tile_rows, out_pad), lambda i: (i, 0)),
        ),
        compiler_params=pltpu.CompilerParams(
            dimension_semantics=("parallel",),
            vmem_limit_bytes=vmem_limit),
    )(x2d, w1c, b1f, w2c, b2f, w3c, b3f)

    # Drop padded output columns and restore (B, T, out_dim).
    return out2d[:, :out_dim].reshape(B, T, out_dim)


def _reference(x, params, normalized=1, compute_dtype=jnp.bfloat16):
    """Pure-JAX reference mirroring the kernel's dtype policy."""
    B, T, _ = x.shape
    h = x.reshape(B * T, -1).astype(compute_dtype)
    w1 = params["w1"].astype(compute_dtype)
    w2 = params["w2"].astype(compute_dtype)
    w3 = params["w3"].astype(compute_dtype)
    h1 = jnp.dot(h, w1, preferred_element_type=jnp.float32) + params["b1"]
    h1 = jnp.maximum(h1, 0.0)
    h2 = jnp.dot(h1.astype(compute_dtype), w2,
                 preferred_element_type=jnp.float32) + params["b2"]
    h2 = jnp.maximum(h2, 0.0)
    out = jnp.dot(h2.astype(compute_dtype), w3,
                  preferred_element_type=jnp.float32) + params["b3"]
    if normalized == 1:
        norm = jnp.sqrt(jnp.sum(out * out, axis=1, keepdims=True))
        out = out / norm
        out = jnp.where(jnp.isnan(out), 0.0, out)
        out = jnp.where(jnp.isinf(out), 0.0, out)
    return out.reshape(B, T, -1)


def _reference_f32(x, params, normalized=1):
    """Full-f32 reference (matches the torch module exactly)."""
    B, T, _ = x.shape
    h = x.reshape(B * T, -1)
    h = jnp.maximum(h @ params["w1"] + params["b1"], 0.0)
    h = jnp.maximum(h @ params["w2"] + params["b2"], 0.0)
    out = h @ params["w3"] + params["b3"]
    if normalized == 1:
        norm = jnp.sqrt(jnp.sum(out * out, axis=1, keepdims=True))
        out = out / norm
        out = jnp.where(jnp.isnan(out), 0.0, out)
        out = jnp.where(jnp.isinf(out), 0.0, out)
    return out.reshape(B, T, -1)


def init_params(key, in_dim, middle_dim, out_dim):
    # Deterministic synthetic init (nn.Linear-like uniform bounds).
    ks = jax.random.split(key, 6)

    def lin(kw, kb, fan_in, fan_out):
        bound = 1.0 / jnp.sqrt(fan_in)
        w = jax.random.uniform(kw, (fan_in, fan_out), jnp.float32, -bound, bound)
        b = jax.random.uniform(kb, (1, fan_out), jnp.float32, -bound, bound)
        return w, b

    w1, b1 = lin(ks[0], ks[1], in_dim, middle_dim)
    w2, b2 = lin(ks[2], ks[3], middle_dim, middle_dim)
    w3, b3 = lin(ks[4], ks[5], middle_dim, out_dim)
    return {"w1": w1, "b1": b1, "w2": w2, "b2": b2, "w3": w3, "b3": b3}


if __name__ == "__main__":
    B, T = 2, 8
    in_dim, middle_dim, out_dim = 32, 64, 16

    key = jax.random.PRNGKey(0)
    kx, kp = jax.random.split(key)
    x = jax.random.normal(kx, (B, T, in_dim), jnp.float32)
    params = init_params(kp, in_dim, middle_dim, out_dim)

    # Main check: kernel vs a reference using the same bf16/f32 dtype policy.
    out = sequence_inception(x, params, normalized=1)
    out = jax.block_until_ready(out)
    ref = _reference(x, params, normalized=1)
    assert out.shape == (B, T, out_dim)
    assert jnp.allclose(out, ref, atol=2e-3, rtol=2e-3), "mismatch vs reference"

    # Loose sanity check against the full-f32 torch-equivalent reference
    # (bf16 operands introduce ~1% error on unit-normalized outputs).
    ref_f32 = _reference_f32(x, params, normalized=1)
    assert jnp.allclose(out, ref_f32, atol=1e-1, rtol=0.0), "semantic drift"

    # Ragged-grid path (n_rows not a multiple of the tile), with normalization
    # enabled so the garbage tail rows go through rsqrt (must be masked off).
    x_odd = jax.random.normal(jax.random.PRNGKey(1), (3, 5, in_dim), jnp.float32)
    out_odd = jax.block_until_ready(sequence_inception(x_odd, params, normalized=1))
    ref_odd = _reference(x_odd, params, normalized=1)
    assert out_odd.shape == (3, 5, out_dim)
    assert jnp.allclose(out_odd, ref_odd, atol=2e-3, rtol=2e-3), "ragged-path mismatch"

    # Un-normalized path on the ragged shape too.
    out_raw = jax.block_until_ready(sequence_inception(x_odd, params, normalized=0))
    ref_raw = _reference(x_odd, params, normalized=0)
    assert jnp.allclose(out_raw, ref_raw, atol=2e-3, rtol=2e-3), "unnormalized mismatch"

    print("KERNEL_OK")
</pallas_src>

<mosaic_0001>
module attributes {stable_mosaic.version = 11 : i64} {
  func.func @_seq_inception_kernel(%arg0: i32, %arg1: memref<8x32xf32, #tpu.memory_space<vmem>>, %arg2: memref<32x128xbf16, #tpu.memory_space<vmem>>, %arg3: memref<1x128xf32, #tpu.memory_space<vmem>>, %arg4: memref<128x128xbf16, #tpu.memory_space<vmem>>, %arg5: memref<1x128xf32, #tpu.memory_space<vmem>>, %arg6: memref<128x128xbf16, #tpu.memory_space<vmem>>, %arg7: memref<1x128xf32, #tpu.memory_space<vmem>>, %arg8: memref<8x128xf32, #tpu.memory_space<vmem>>) attributes {dimension_semantics = [#tpu.dimension_semantics<parallel>], iteration_bounds = array<i64: 2>, scalar_prefetch = 0 : i64, scratch_operands = 0 : i64, tpu.core_type = #tpu.core_type<tc>, window_params = [{transform_indices = @transform_0, window_bounds = array<i64: 8, 32>}, {pipeline_mode = #tpu.pipeline_mode<synchronous>, transform_indices = @transform_1, window_bounds = array<i64: 32, 128>}, {pipeline_mode = #tpu.pipeline_mode<synchronous>, transform_indices = @transform_2, window_bounds = array<i64: 1, 128>}, {pipeline_mode = #tpu.pipeline_mode<synchronous>, transform_indices = @transform_3, window_bounds = array<i64: 128, 128>}, {pipeline_mode = #tpu.pipeline_mode<synchronous>, transform_indices = @transform_4, window_bounds = array<i64: 1, 128>}, {pipeline_mode = #tpu.pipeline_mode<synchronous>, transform_indices = @transform_5, window_bounds = array<i64: 128, 128>}, {pipeline_mode = #tpu.pipeline_mode<synchronous>, transform_indices = @transform_6, window_bounds = array<i64: 1, 128>}, {transform_indices = @transform_7, window_bounds = array<i64: 8, 128>}]} {
    %c0 = arith.constant 0 : index
    %c0_0 = arith.constant 0 : index
    %0 = vector.load %arg1[%c0, %c0_0] : memref<8x32xf32, #tpu.memory_space<vmem>>, vector<8x32xf32>
    %1 = arith.truncf %0 : vector<8x32xf32> to vector<8x32xbf16>
    %c0_1 = arith.constant 0 : index
    %c0_2 = arith.constant 0 : index
    %2 = vector.load %arg2[%c0_1, %c0_2] : memref<32x128xbf16, #tpu.memory_space<vmem>>, vector<32x128xbf16>
    %cst = arith.constant dense<0.000000e+00> : vector<8x128xf32>
    %3 = tpu.matmul %1, %2, %cst {dimension_numbers = #tpu.dot_dimension_numbers<[1], [0], [0], [1], [0, 0, 1, 1], [], []>} : vector<8x32xbf16>, vector<32x128xbf16>, vector<8x128xf32> -> vector<8x128xf32>
    %c0_3 = arith.constant 0 : index
    %c0_4 = arith.constant 0 : index
    %4 = vector.load %arg3[%c0_3, %c0_4] : memref<1x128xf32, #tpu.memory_space<vmem>>, vector<1x128xf32>
    %5 = vector.broadcast %4 : vector<1x128xf32> to vector<8x128xf32>
    %6 = arith.addf %3, %5 : vector<8x128xf32>
    %cst_5 = arith.constant 0.000000e+00 : f32
    %7 = vector.broadcast %cst_5 : f32 to vector<8x128xf32>
    %8 = arith.maximumf %6, %7 : vector<8x128xf32>
    %9 = arith.truncf %8 : vector<8x128xf32> to vector<8x128xbf16>
    %c0_6 = arith.constant 0 : index
    %c0_7 = arith.constant 0 : index
    %10 = vector.load %arg4[%c0_6, %c0_7] : memref<128x128xbf16, #tpu.memory_space<vmem>>, vector<128x128xbf16>
    %cst_8 = arith.constant dense<0.000000e+00> : vector<8x128xf32>
    %11 = tpu.matmul %9, %10, %cst_8 {dimension_numbers = #tpu.dot_dimension_numbers<[1], [0], [0], [1], [0, 0, 1, 1], [], []>} : vector<8x128xbf16>, vector<128x128xbf16>, vector<8x128xf32> -> vector<8x128xf32>
    %c0_9 = arith.constant 0 : index
    %c0_10 = arith.constant 0 : index
    %12 = vector.load %arg5[%c0_9, %c0_10] : memref<1x128xf32, #tpu.memory_space<vmem>>, vector<1x128xf32>
    %13 = vector.broadcast %12 : vector<1x128xf32> to vector<8x128xf32>
    %14 = arith.addf %11, %13 : vector<8x128xf32>
    %cst_11 = arith.constant 0.000000e+00 : f32
    %15 = vector.broadcast %cst_11 : f32 to vector<8x128xf32>
    %16 = arith.maximumf %14, %15 : vector<8x128xf32>
    %17 = arith.truncf %16 : vector<8x128xf32> to vector<8x128xbf16>
    %c0_12 = arith.constant 0 : index
    %c0_13 = arith.constant 0 : index
    %18 = vector.load %arg6[%c0_12, %c0_13] : memref<128x128xbf16, #tpu.memory_space<vmem>>, vector<128x128xbf16>
    %cst_14 = arith.constant dense<0.000000e+00> : vector<8x128xf32>
    %19 = tpu.matmul %17, %18, %cst_14 {dimension_numbers = #tpu.dot_dimension_numbers<[1], [0], [0], [1], [0, 0, 1, 1], [], []>} : vector<8x128xbf16>, vector<128x128xbf16>, vector<8x128xf32> -> vector<8x128xf32>
    %c0_15 = arith.constant 0 : index
    %c0_16 = arith.constant 0 : index
    %20 = vector.load %arg7[%c0_15, %c0_16] : memref<1x128xf32, #tpu.memory_space<vmem>>, vector<1x128xf32>
    %21 = vector.broadcast %20 : vector<1x128xf32> to vector<8x128xf32>
    %22 = arith.addf %19, %21 : vector<8x128xf32>
    %23 = arith.mulf %22, %22 : vector<8x128xf32>
    %cst_17 = arith.constant dense<0.000000e+00> : vector<8xf32>
    %24 = vector.multi_reduction <add>, %23, %cst_17 [1] : vector<8x128xf32> to vector<8xf32>
    %25 = vector.shape_cast %24 : vector<8xf32> to vector<8x1xf32>
    %26 = math.rsqrt %25 : vector<8x1xf32>
    %27 = vector.broadcast %26 : vector<8x1xf32> to vector<8x128xf32>
    %28 = arith.mulf %22, %27 : vector<8x128xf32>
    %29 = tpu.weird %28 : vector<8x128xf32> -> vector<8x128xi1>
    %cst_18 = arith.constant dense<true> : vector<8x128xi1>
    %30 = arith.xori %29, %cst_18 : vector<8x128xi1>
    %cst_19 = arith.constant 0.000000e+00 : f32
    %31 = vector.broadcast %cst_19 : f32 to vector<8x128xf32>
    %32 = arith.select %30, %28, %31 : vector<8x128xi1>, vector<8x128xf32>
    %c0_20 = arith.constant 0 : index
    %c0_21 = arith.constant 0 : index
    %33 = vector.load %arg8[%c0_20, %c0_21] : memref<8x128xf32, #tpu.memory_space<vmem>>, vector<8x128xf32>
    tpu.vector_store %arg8[%c0_20, %c0_21], %32 {strides = array<i32>} : memref<8x128xf32, #tpu.memory_space<vmem>>, vector<8x128xf32>,
    return
  }
  func.func @transform_0(%arg0: i32) -> (i32, i32) {
    %c0_i32 = arith.constant 0 : i32
    %c0_i32_0 = arith.constant 0 : i32
    return %arg0, %c0_i32 : i32, i32
  }
  func.func @transform_1(%arg0: i32) -> (i32, i32) {
    %c0_i32 = arith.constant 0 : i32
    %c0_i32_0 = arith.constant 0 : i32
    %c0_i32_1 = arith.constant 0 : i32
    return %c0_i32, %c0_i32_0 : i32, i32
  }
  func.func @transform_2(%arg0: i32) -> (i32, i32) {
    %c0_i32 = arith.constant 0 : i32
    %c0_i32_0 = arith.constant 0 : i32
    %c0_i32_1 = arith.constant 0 : i32
    return %c0_i32, %c0_i32_0 : i32, i32
  }
  func.func @transform_3(%arg0: i32) -> (i32, i32) {
    %c0_i32 = arith.constant 0 : i32
    %c0_i32_0 = arith.constant 0 : i32
    %c0_i32_1 = arith.constant 0 : i32
    return %c0_i32, %c0_i32_0 : i32, i32
  }
  func.func @transform_4(%arg0: i32) -> (i32, i32) {
    %c0_i32 = arith.constant 0 : i32
    %c0_i32_0 = arith.constant 0 : i32
    %c0_i32_1 = arith.constant 0 : i32
    return %c0_i32, %c0_i32_0 : i32, i32
  }
  func.func @transform_5(%arg0: i32) -> (i32, i32) {
    %c0_i32 = arith.constant 0 : i32
    %c0_i32_0 = arith.constant 0 : i32
    %c0_i32_1 = arith.constant 0 : i32
    return %c0_i32, %c0_i32_0 : i32, i32
  }
  func.func @transform_6(%arg0: i32) -> (i32, i32) {
    %c0_i32 = arith.constant 0 : i32
    %c0_i32_0 = arith.constant 0 : i32
    %c0_i32_1 = arith.constant 0 : i32
    return %c0_i32, %c0_i32_0 : i32, i32
  }
  func.func @transform_7(%arg0: i32) -> (i32, i32) {
    %c0_i32 = arith.constant 0 : i32
    %c0_i32_0 = arith.constant 0 : i32
    return %arg0, %c0_i32 : i32, i32
  }
}

</mosaic_0001>

<bundles_post_ra>
// kernel: tpu_custom_call.1
= control target key start
LH: loop header
LB: loop body
LE: loop exit
PB: predicated region body
PF: predicated region fallthrough
CT: control target
= control target key end

     0   :  { %s1290_s0 = inlined_call_operand.hbm [shape: f32[16,32], index: 0, kind: input, shape index: {}]   ;;  %s1291_s1 = inlined_call_operand.hbm [shape: bf16[32,128], index: 1, kind: input, shape index: {}]   ;;  %s1292_s2 = inlined_call_operand.vmem [shape: f32[1,128], index: 2, kind: input, shape index: {}]   ;;  %s1293_s3 = inlined_call_operand.hbm [shape: bf16[128,128], index: 3, kind: input, shape index: {}]   ;;  %s1294_s4 = inlined_call_operand.vmem [shape: f32[1,128], index: 4, kind: input, shape index: {}]   ;;  %s1295_s5 = inlined_call_operand.hbm [shape: bf16[128,128], index: 5, kind: input, shape index: {}]   ;;  %s1296_s6 = inlined_call_operand.vmem [shape: f32[1,128], index: 6, kind: input, shape index: {}]   ;;  %s1297_s7 = inlined_call_operand.hbm [shape: f32[16,128], index: 7, kind: output, shape index: {}]  }
   0x1   :  { %1298 = sst [smem:[#allocation15_spill]] %s1291_s1 }
   0x2   :  { %12 = vsyncpa [#allocation3], 0 }
   0x3   :  { %14 = vsyncpa [#allocation3 + $0x1], 0 }
   0x4   :  { %15 = vsyncpa [#allocation6], 0 }
   0x5   :  { %16 = vsyncpa [#allocation9], 0 }
   0x6   :  { %17 = vsyncpa [#allocation4], 0 }
   0x7   :  { %19 = vsyncpa [#allocation4 + $0x1], 0  ;;  %s1121_s24 = smov 0   ;;  %s1123_s25 = smov 0  }
   0x8   :  { %s1125_s26 = smov 0   ;;  %s1127_s27 = smov 0  }
   0x9 LB: > { %s1299_s1 = sld [smem:[#allocation15_spill]]  ;;  %s1145_s8 = sadd.s32 4294967295, %s1073_s27   ;;  %s1073_s27 = sphi %s1127_s27, %s1310_s27   ;;  %s1069_s26 = sphi %s1125_s26, %s1309_s26   ;;  %s1065_s25 = sphi %s1123_s25, %s1308_s25   ;;  %s1061_s24 = sphi %s1121_s24, %s1307_s24  }
   0xa   : > { %p686_p0 = scmp.ge.s32.totalorder %s1073_s27, 1  ;;  %p46_p1 = scmp.eq.s32.totalorder %s1145_s8, 0 }
   0xb   : > { %p208_p2 = scmp.lt.s32.totalorder %s1073_s27, 3  ;;  %s1075_s10 = smov [#allocation5]  }
   0xc   : > { %s221_s11 = sshll.u32 %s1075_s10, 4  ;;  %s236_s14 = sshll.u32 %s1293_s3, 4  ;;  %s222_s11 = int_to_ptr.vmem [resolvable:$true] %s221_s11  ;;  %s237_s14 = int_to_ptr.hbm [resolvable:$true] %s236_s14 }
   0xd   : > { %p1150_p3 = pnand %p686_p0, %p208_p2  ;;  %s253_s18 = sshll.u32 %s1295_s5, 4  ;;  %s254_s18 = int_to_ptr.hbm [resolvable:$true] %s253_s18 }
   0xe   : > { %s1076_s19 = smov [#allocation7]   ;;  %s1077_s21 = smov 64  }
   0xf   : > { %s219_s30 = sshll.u32 %s1299_s1, 4  ;;  %p810_p4 = pneg %p1150_p3  ;;  %s220_s30 = int_to_ptr.hbm [resolvable:$true] %s219_s30 }
  0x10   : > { %s238_s20 = sshll.u32 %s1076_s19, 4  ;;  %s1078_s22 = smov 4   ;;  %s239_s20 = int_to_ptr.vmem [resolvable:$true] %s238_s20 }
  0x11   : > { %p1162_p6 = pnand %p810_p4, %p46_p1  ;;  %s1079_s23 = smov [#allocation8]  }
  0x12   : > { %s255_s28 = sshll.u32 %s1079_s23, 4  ;;  %s685_s29 = sadd.s32 4294967294, %s1073_s27   ;;  %s256_s28 = int_to_ptr.vmem [resolvable:$true] %s255_s28 }
  0x13   : > { %813 = dma.hbm_to_vmem [thread:$0]  (!%p1162_p6), %s220_s30, 256, %s222_s11, [#allocation6], %s1077_s21, %s1077_s21, %s1078_s22  }
  0x14   : > { %816 = dma.hbm_to_vmem [thread:$0]  (!%p1162_p6), %s237_s14, 1024, %s239_s20, [#allocation6], %s1077_s21, %s1077_s21, %s1078_s22  }
  0x15   : > { %819 = dma.hbm_to_vmem [thread:$0]  (!%p1162_p6), %s254_s18, 1024, %s256_s28, [#allocation9], %s1077_s21, %s1077_s21, %s1078_s22  }
  0x16   : > { %s1177_s10 = sadd.s32 1, %s1073_s27   ;;  %s32_s12 = sadd.s32 1, %s1069_s26 }
  0x17   : > { %s29_s30 = ssub.s32 %s1073_s27, %s1177_s10  ;;  %p39_p7 = scmp.ne.s32.totalorder %s1069_s26, %s1065_s25 }
  0x18   : > { %p30_p8 = scmp.eq.s32.totalorder %s29_s30, 0  ;;  %p40_p9 = scmp.eq.s32.totalorder %s1073_s27, 0 }
  0x19   : > { %p45_p10 = scmp.ne.s32.totalorder %s1065_s25, %s1061_s24  ;;  %p195_p11 = scmp.eq.s32.totalorder %s1145_s8, 1 }
  0x1a   : > { %s1189_s11 = scalar_select %p30_p8, %s1069_s26, %s32_s12  }
  0x1b   : > { %p1193_p12 = por %p46_p1, %p45_p10  ;;  %p1197_p13 = por %p195_p11, %p39_p7 }
  0x1c   : > { %p201_p0 = scmp.eq.s32.totalorder %s685_s29, 1  ;;  %p41_p2 = por %p40_p9, %p39_p7 }
  0x1d   : > { %s272_s15 = sand.u32 1, %s1069_s26   ;;  %p831_p6 = scmp.lt.s32.totalorder %s1073_s27, 2 }
  0x1e   : > { %p1202_p4 = por %p201_p0, %p45_p10  ;;  %s691_s17 = sshll.u32 %s272_s15, 3 }
  0x1f   : > { %s692_s18 = sshll.u32 %s1073_s27, 3  ;;  %s276_s23 = scalar_lea.vmem [#allocation2], %s691_s17 }
  0x20   : > { %s280_s21 = scalar_lea.hbm %s1290_s0, %s692_s18  ;;  %s284_s28 = sshll.u32 %s276_s23, 4  ;;  %s285_s28 = int_to_ptr.vmem [resolvable:$true] %s284_s28 }
  0x21   : > { %s282_s22 = sshll.u32 %s280_s21, 4  ;;  %p1211_p8 = pnand %p831_p6, %p41_p2  ;;  %s283_s22 = int_to_ptr.hbm [resolvable:$true] %s282_s22 }
  0x22   : > { %s273_s12 = scalar_lea.sflag [#allocation3], %s272_s15  ;;  %s969_s30 = sshra.s32 %s283_s22, 4  ;;  %s970_s30 = int_to_ptr.hbm [resolvable:$true] %s969_s30 }
  0x23   : > { %s971_s1 = scalar_lea.hbm %s970_s30, 8  ;;  %p973_p9 = pneg %p1211_p8 }
  0x24   : > { %p972_p7 = scmp.ne.s32.totalorder %s970_s30, %s971_s1  ;;  %s976_s17 = scalar_lea.hbm %s1290_s0, 16 }
  0x25   : > { %p977_p0 = scmp.lt.s32.totalorder %s970_s30, %s1290_s0  ;;  %p978_p2 = scmp.lt.s32.totalorder %s976_s17, %s971_s1 }
  0x26   : > { %p974_p10 = pnand %p973_p9, %p972_p7 }
  0x27   : > { %p979_p6 = por %p978_p2, %p977_p0 }
  0x28   : > { %p975_p11 = pneg %p974_p10 }
  0x2a   : > { %p980_p5 = pnand %p979_p6, %p975_p11 }
  0x2c   : > { %983 = shalt.err (!%p980_p5)
}
  0x2d   : > { %823 = dma.hbm_to_vmem [thread:$0]  (!%p1211_p8), %s283_s22, 128, %s285_s28, %s273_s12  }
  0x2e   : > { %293 = sbr.rel (%p1150_p3) target bundleno = 606 (0x25e), region = 48  ;;  %s1228_s15 = sand.u32 (!%p1150_p3), 1, %s1065_s25  }
  0x2f   : > { %s694_s23 = sshll.u32 (!%p1150_p3), %s1228_s15, 3  ;;  %s296_s18 = scalar_lea.sflag (!%p1150_p3), [#allocation3], %s1228_s15 }
  0x30   : > { %s299_s1 = scalar_lea.vmem (!%p1150_p3), [#allocation2], %s694_s23 }
  0x33   : > { %1044 = dma.done.wait (%p1193_p12), %s296_s18, 128  }
  0x34   : > { %1046 = vsyncadd (%p1193_p12), %s296_s18, 4294967168 }
  0x35   : > { %1048 = dma.done.wait (%p46_p1), [#allocation6], 1280  }
  0x36   : > { %1050 = vsyncadd (%p46_p1), [#allocation6], 4294966016 }
  0x37   : > { %1052 = dma.done.wait (%p46_p1), [#allocation9], 1024  }
  0x38   : > { %1054 = vsyncadd (%p46_p1), [#allocation9], 4294966272  ;;  %v777_v0 = vld [vmem:[#allocation5 + $0x8] sm:$0xff]  ;;  %v776_v2 = vld [vmem:[#allocation5] sm:$0xff]  ;;  %vm369_vm0 = vcmask 261120   ;;  %s773_s30 = sshll.u32 %s1145_s8, 3 }
  0x39   : > { %v785_v1 = vld [vmem:[#allocation7 + $0x38] sm:$0xff]  ;;  %379 = vmatpush.bf16.msra.mxu0 %v777_v0  ;;  %v347_v3 = vld [vmem:[%s299_s1] sm:$0xff]  ;;  %v784_v4 = vld [vmem:[#allocation7 + $0x30] sm:$0xff]  ;;  %s581_s20 = scalar_lea.hbm %s1297_s7, %s773_s30  ;;  %s345_s21 = scalar_lea.vmem [#allocation10], %s694_s23  ;;  %vm1080_vm5 = vmmov 1  }
  0x3a   : > { %456 = vmatpush.bf16.msra.mxu1 %v785_v1  ;;  %v348_v5 = vpack.c.bf16 %v347_v3, %v347_v3  ;;  %v783_v6 = vld [vmem:[#allocation7 + $0x28] sm:$0xff]  ;;  %v782_v7 = vld [vmem:[#allocation7 + $0x20] sm:$0xff]  ;;  %v781_v8 = vld [vmem:[#allocation7 + $0x18] sm:$0xff]  ;;  %s583_s18 = sshll.u32 %s345_s21, 4  ;;  %s585_s1 = sshll.u32 %s581_s20, 4  ;;  %s584_s18 = int_to_ptr.vmem [resolvable:$true] %s583_s18  ;;  %s586_s1 = int_to_ptr.hbm [resolvable:$true] %s585_s1 }
  0x3b   : > { %v780_v9 = vld [vmem:[#allocation7 + $0x10] sm:$0xff]  ;;  %v779_v10 = vld [vmem:[#allocation7 + $0x8] sm:$0xff]  ;;  %v778_v11 = vld [vmem:[#allocation7] sm:$0xff]  ;;  %s571_s8 = scalar_lea.sflag [#allocation4], %s1228_s15  ;;  %s1013_s9 = sshra.s32 %s586_s1, 4  ;;  %s1014_s9 = int_to_ptr.hbm [resolvable:$true] %s1013_s9 }
  0x3c   : > { %v793_v12 = vld [vmem:[#allocation8 + $0x38] sm:$0xff]  ;;  %v792_v13 = vld [vmem:[#allocation8 + $0x30] sm:$0xff]  ;;  %v791_v14 = vld [vmem:[#allocation8 + $0x28] sm:$0xff]  ;;  %s1015_s13 = scalar_lea.hbm %s1014_s9, 8  ;;  %s1019_s23 = scalar_lea.hbm %s1297_s7, 16 }
  0x3d   : > { %380 = vmatpush.bf16.msra.mxu0 %v776_v2  ;;  %539 = vmatpush.bf16.msra.mxu2 %v793_v12  ;;  %v790_v15 = vld [vmem:[#allocation8 + $0x20] sm:$0xff]  ;;  %v789_v16 = vld [vmem:[#allocation8 + $0x18] sm:$0xff]  ;;  %v788_v17 = vld [vmem:[#allocation8 + $0x10] sm:$0xff]  ;;  %p1016_p1 = scmp.ne.s32.totalorder %s1014_s9, %s1015_s13  ;;  %p1020_p12 = scmp.lt.s32.totalorder %s1014_s9, %s1297_s7 }
  0x3e   : > { %457 = vmatpush.bf16.msra.mxu1 %v784_v4  ;;  %v874_v18 = vld [vmem:[%s1292_s2] ss:$0 sm:$0xff]  ;;  %v787_v24 = vld [vmem:[#allocation8 + $0x8] sm:$0xff]  ;;  %p1021_p8 = scmp.lt.s32.totalorder %s1019_s23, %s1015_s13 }
  0x3f   : > { %v786_v25 = vld [vmem:[#allocation8] sm:$0xff]  ;;  %p1017_p3 = pnand %p1016_p1, %p1197_p13 }
  0x40   : > { %707 = vmatmul.msk.bf16.vlgmr.msra.gmra.mxu0 %vm369_vm0, %v348_v5  ;;  %v875_v26 = vld [vmem:[%s1294_s4] ss:$0 sm:$0xff]  ;;  %p1022_p7 = por %p1021_p8, %p1020_p12 }
  0x41   : > { %540 = vmatpush.bf16.msra.mxu2 %v792_v13  ;;  %v876_v32 = vld [vmem:[%s1296_s6] ss:$0 sm:$0xff]  ;;  %p1018_p5 = pneg %p1017_p3 }
  0x42   : > { %458 = vmatpush.bf16.msra.mxu1 %v783_v6 }
  0x43   : > { %p1023_p9 = pnand %p1022_p7, %p1018_p5 }
  0x45   : > { %541 = vmatpush.bf16.msra.mxu2 %v791_v14 }
  0x46   : > { %459 = vmatpush.bf16.msra.mxu1 %v782_v7 }
  0x49   : > { %542 = vmatpush.bf16.msra.mxu2 %v790_v15 }
  0x4a   : > { %460 = vmatpush.bf16.msra.mxu1 %v781_v8 }
  0x4d   : > { %543 = vmatpush.bf16.msra.mxu2 %v789_v16 }
  0x4e   : > { %461 = vmatpush.bf16.msra.mxu1 %v780_v9 }
  0x51   : > { %544 = vmatpush.bf16.msra.mxu2 %v788_v17 }
  0x52   : > { %462 = vmatpush.bf16.msra.mxu1 %v779_v10 }
  0x55   : > { %545 = vmatpush.bf16.msra.mxu2 %v787_v24 }
  0x56   : > { %463 = vmatpush.bf16.msra.mxu1 %v778_v11 }
  0x59   : > { %546 = vmatpush.bf16.msra.mxu2 %v786_v25 }
  0xbd   : > { %v382_v19 = vpop.f32.mrf.mxu0 }
  0xbe   : > { %v383_v20 = vadd.f32 %v874_v18, %v382_v19 }
  0xc0   : > { %v386_v21 = vmax.f32 %v383_v20, 0.0 }
  0xc2   : > { %v387_v22 = vpack.c.bf16 %v386_v21, %v386_v21 }
  0xc4   : > { %464 = vmatmul.bf16.vlgmr.msra.gmra.mxu1 %v387_v22 }
  0xc5   : > { %v384_v23 = vpop.f32.mrf.mxu0 }
 0x141   : > { %v465_v27 = vpop.f32.mrf.mxu1 }
 0x142   : > { %v466_v28 = vadd.f32 %v875_v26, %v465_v27 }
 0x144   : > { %v469_v29 = vmax.f32 %v466_v28, 0.0 }
 0x146   : > { %v470_v30 = vpack.c.bf16 %v469_v29, %v469_v29 }
 0x148   : > { %547 = vmatmul.bf16.vlgmr.msra.gmra.mxu2 %v470_v30 }
 0x149   : > { %v467_v31 = vpop.f32.mrf.mxu1 }
 0x1cb   : > { %v548_v33 = vpop.f32.mrf.mxu2 }
 0x1cc   : > { %v549_v34 = vadd.f32 %v876_v32, %v548_v33 }
 0x1ce   : > { %v552_v35 = vmul.f32 %v549_v34, %v549_v34 }
 0x1d0   : > { %553 = vadd.xlane.f32.xlu0 %v552_v35 }
 0x1d3   : > { %v550_v36 = vpop.f32.mrf.mxu2 }
 0x243   : > { %v554_v37 = vpop.xlane.xlu0 %553 }
 0x244   : > { %877 = vrsqrt.f32 %v554_v37  ;;  %vm561_vm2 = vweird.f32 %v554_v37 }
 0x24a   : > { %v878_v38 = vpop.eup %877 }
 0x24b   : > { %v556_v39 = vmul.f32 %v878_v38, %v554_v37  ;;  %vm562_vm1 = vweird.f32 %v878_v38 }
 0x24c   : > { %vm563_vm3 = vmor %vm561_vm2, %vm562_vm1 }
 0x24d   : > { %v557_v40 = vmul.f32 %v878_v38, %v556_v39 }
 0x24f   : > { %v558_v41 = vmul.f32 0.5, %v557_v40 }
 0x251   : > { %v559_v42 = vsub.f32 1.5, %v558_v41 }
 0x253   : > { %v560_v43 = vmul.f32 %v878_v38, %v559_v42 }
 0x255   : > { %v564_v44 = vsel %vm563_vm3, %v878_v38, %v560_v43 }
 0x256   : > { %v565_v45 = vmul.f32 %v564_v44, %v549_v34 }
 0x258   : > { %vm566_vm4 = vweird.f32 %v565_v45 }
 0x259   : > { %vm567_vm6 = vmxor %vm566_vm4, %vm1080_vm5 }
 0x25a   : > { %v568_v46 = vsel %vm567_vm6, %v565_v45, 0.0 }
 0x25b   : > { %569 = vst [vmem:[%s345_s21] sm:$0xff] %v568_v46 }
 0x25c   : > { %1026 = shalt.err (!%p1023_p9)
}
 0x25d   : > { %808 = dma.vmem_to_hbm [thread:$0]  (%p1197_p13), %s584_s18, 128, %s586_s1, %s571_s8  }
 0x25e PF: > { %s597_s15 = sand.u32 1, %s1061_s24   ;;  %p1306_p10 = scmp.ge.s32.totalorder %s1073_s27, 2 }
 0x25f   : > { %s598_s30 = scalar_lea.sflag [#allocation4], %s597_s15 }
 0x260   : > { %p825_p11 = pnand %p1306_p10, %p1202_p4 }
 0x262   : > { %p826_p0 = pneg %p825_p11 }
 0x264   : > { %1056 = dma.done.wait (%p826_p0), %s598_s30, 128  }
 0x265   : > { %1058 = vsyncadd (%p826_p0), %s598_s30, 4294967168  ;;  %p22_p2 = scmp.ge.s32.totalorder %s1177_s10, 4   ;;  %s1307_s24 = smov %s1065_s25 }
 0x266   : > { %s1308_s25 = smov %s1069_s26  ;;  %s1309_s26 = smov %s1189_s11 }
 0x267   : > { %s1310_s27 = smov %s1177_s10  ;;  %24 = sbr.rel (!%p22_p2) target bundleno = 9 (0x9), region = 105 }
 0x26c   :  { %604 = vsyncpa [#allocation3], 1 }
 0x26d   :  { %606 = vsyncpa [#allocation3 + $0x1], 1 }
 0x26e   :  { %607 = vsyncpa [#allocation6], 1 }
 0x26f   :  { %608 = vsyncpa [#allocation9], 1 }
 0x270   :  { %609 = vsyncpa [#allocation4], 1 }
 0x271   :  { %611 = vsyncpa [#allocation4 + $0x1], 1 }

</bundles_post_ra>
